<compile_context>
chip_gen: v6e
topology: v6e:2x2x1
jax: 0.10.0
libtpu: 0.0.40
codegen_flags: <defaults>
</compile_context>

<pallas_src>
import functools

import jax
import jax.numpy as jnp
from jax.experimental import pallas as pl
from jax.experimental.pallas import tpu as pltpu


def _round_up(x, m):
    return ((x + m - 1) // m) * m


def _patch_embed_kernel(p_ref, w_ref, b_ref, o_ref):
    # p_ref: (tm, Kp) bf16 rows of flattened patches (lane-aligned K)
    # w_ref: (Kp, E)  bf16 projection weight, resident across the grid
    # b_ref: (1, E)   f32 bias, resident
    # o_ref: (tm, E)  output rows
    acc = jnp.dot(p_ref[...], w_ref[...], preferred_element_type=jnp.float32)
    # f32 bias epilogue fused into the GEMM step -> no extra HBM round trip.
    o_ref[...] = (acc + b_ref[...]).astype(o_ref.dtype)


def patch_embed(x, weight, bias, *, patch_size, block_rows=512):
    """PatchEmbed forward.

    x:      (B, C, H, W)  input image batch
    weight: (E, C, P, P)  PyTorch Conv2d weight layout (OIHW)
    bias:   (E,)          Conv2d bias
    returns (B, num_patches, E) in x.dtype
    """
    B, C, H, W = x.shape
    E = weight.shape[0]
    P = patch_size
    assert H % P == 0 and W % P == 0, "image size must be divisible by patch size"
    gh, gw = H // P, W // P
    N = gh * gw
    K = C * P * P
    Kp = _round_up(K, 128)  # lane / MXU-contraction alignment; zero pad is exact

    # im2col: non-overlapping patches, (c, p, q) ordering matches weight.reshape(E, K).
    # Pure layout, no compute; with allow_input_fusion it can fuse into the Pallas
    # input DMA under jit instead of materializing a separate HBM copy.
    patches = x.reshape(B, C, gh, P, gw, P)
    patches = patches.transpose(0, 2, 4, 1, 3, 5)              # (B, gh, gw, C, P, P)
    patches = patches.reshape(B * N, K)
    if Kp != K:
        patches = jnp.pad(patches, ((0, 0), (0, Kp - K)))
    patches = patches.astype(jnp.bfloat16)                      # bf16 MXU operand

    w2d = weight.reshape(E, K).T                                 # (K, E)
    if Kp != K:
        w2d = jnp.pad(w2d, ((0, Kp - K), (0, 0)))
    w2d = w2d.astype(jnp.bfloat16)                               # bf16 MXU operand
    b2d = bias.reshape(1, E).astype(jnp.float32)                 # f32 epilogue

    # Row tiling: big lane-dense blocks; ragged last block relies on Pallas's
    # masked boundary store (each output row depends only on its own input row,
    # so out-of-bounds garbage in the final input tile never reaches a kept row).
    M = B * N
    tm = min(block_rows, _round_up(M, 8))
    grid = (pl.cdiv(M, tm),)

    out = pl.pallas_call(
        _patch_embed_kernel,
        out_shape=jax.ShapeDtypeStruct((M, E), x.dtype),
        grid_spec=pltpu.PrefetchScalarGridSpec(
            num_scalar_prefetch=0,
            grid=grid,
            in_specs=[
                pl.BlockSpec((tm, Kp), lambda m: (m, 0)),        # patch rows, tiled over M
                pl.BlockSpec((Kp, E), lambda m: (0, 0),          # weight: resident, 1 buffer
                             pipeline_mode=pl.Buffered(1)),
                pl.BlockSpec((1, E), lambda m: (0, 0),           # bias:   resident, 1 buffer
                             pipeline_mode=pl.Buffered(1)),
            ],
            out_specs=pl.BlockSpec((tm, E), lambda m: (m, 0)),
        ),
        compiler_params=pltpu.CompilerParams(
            # Row blocks are independent -> megacore sharding where available.
            # TODO(synk): if v7x profiling shows no 2-TC sharding, switch this axis
            # to pltpu.CORE_PARALLEL.
            dimension_semantics=("parallel",),
            # Let XLA fuse the im2col layout chain into the patch operand read.
            allow_input_fusion=[True, False, False],
        ),
    )(patches, w2d, b2d)

    return out.reshape(B, N, E)


if __name__ == "__main__":
    # Small shapes consistent with the module: 16x16 image, 4x4 patches,
    # 3 input channels, embed_dim=128 (lane-dense last dim).
    B, C, IMG, P, E = 2, 3, 16, 4, 128
    N = (IMG // P) ** 2  # 16 patches

    key = jax.random.PRNGKey(0)
    kx, kw, kb = jax.random.split(key, 3)
    x = jax.random.normal(kx, (B, C, IMG, IMG), dtype=jnp.float32)
    fan_in = C * P * P
    w = jax.random.normal(kw, (E, C, P, P), dtype=jnp.float32) / jnp.sqrt(fan_in)
    b = jax.random.normal(kb, (E,), dtype=jnp.float32) * 0.02

    fwd = jax.jit(functools.partial(patch_embed, patch_size=P))
    out = jax.block_until_ready(fwd(x, w, b))

    # Reference: Conv2d(stride=patch) -> flatten(2) -> transpose(1, 2)
    ref = jax.lax.conv_general_dilated(
        x, w, window_strides=(P, P), padding="VALID",
        dimension_numbers=("NCHW", "OIHW", "NCHW"),
        precision=jax.lax.Precision.HIGHEST)
    ref = ref + b.reshape(1, E, 1, 1)
    ref = ref.reshape(B, E, N).transpose(0, 2, 1)                # (B, N, E)

    assert out.shape == (B, N, E)
    assert out.dtype == x.dtype
    # Tolerance scaled to the output magnitude: bf16-operand MXU rounding stays
    # well inside it, while real wiring bugs (O(max|ref|)) still trip it.
    scale = float(jnp.max(jnp.abs(ref)))
    max_err = float(jnp.max(jnp.abs(out - ref)))
    assert max_err <= 2e-2 * scale + 1e-3, f"mismatch vs reference: {max_err} (scale {scale})"

    print("KERNEL_OK")
</pallas_src>

<mosaic_0001>
module attributes {stable_mosaic.version = 11 : i64} {
  func.func @_patch_embed_kernel(%arg0: i32, %arg1: memref<32x128xbf16, #tpu.memory_space<vmem>>, %arg2: memref<128x128xbf16, #tpu.memory_space<vmem>>, %arg3: memref<1x128xf32, #tpu.memory_space<vmem>>, %arg4: memref<32x128xf32, #tpu.memory_space<vmem>>) attributes {dimension_semantics = [#tpu.dimension_semantics<parallel>], iteration_bounds = array<i64: 1>, scalar_prefetch = 0 : i64, scratch_operands = 0 : i64, tpu.core_type = #tpu.core_type<tc>, window_params = [{transform_indices = @transform_0, window_bounds = array<i64: 32, 128>}, {pipeline_mode = #tpu.pipeline_mode<synchronous>, transform_indices = @transform_1, window_bounds = array<i64: 128, 128>}, {pipeline_mode = #tpu.pipeline_mode<synchronous>, transform_indices = @transform_2, window_bounds = array<i64: 1, 128>}, {transform_indices = @transform_3, window_bounds = array<i64: 32, 128>}]} {
    %c0 = arith.constant 0 : index
    %c0_0 = arith.constant 0 : index
    %0 = vector.load %arg1[%c0, %c0_0] : memref<32x128xbf16, #tpu.memory_space<vmem>>, vector<32x128xbf16>
    %c0_1 = arith.constant 0 : index
    %c0_2 = arith.constant 0 : index
    %1 = vector.load %arg2[%c0_1, %c0_2] : memref<128x128xbf16, #tpu.memory_space<vmem>>, vector<128x128xbf16>
    %cst = arith.constant dense<0.000000e+00> : vector<32x128xf32>
    %2 = tpu.matmul %0, %1, %cst {dimension_numbers = #tpu.dot_dimension_numbers<[1], [0], [0], [1], [0, 0, 1, 1], [], []>} : vector<32x128xbf16>, vector<128x128xbf16>, vector<32x128xf32> -> vector<32x128xf32>
    %c0_3 = arith.constant 0 : index
    %c0_4 = arith.constant 0 : index
    %3 = vector.load %arg3[%c0_3, %c0_4] : memref<1x128xf32, #tpu.memory_space<vmem>>, vector<1x128xf32>
    %4 = vector.broadcast %3 : vector<1x128xf32> to vector<32x128xf32>
    %5 = arith.addf %2, %4 : vector<32x128xf32>
    %c0_5 = arith.constant 0 : index
    %c0_6 = arith.constant 0 : index
    %6 = vector.load %arg4[%c0_5, %c0_6] : memref<32x128xf32, #tpu.memory_space<vmem>>, vector<32x128xf32>
    tpu.vector_store %arg4[%c0_5, %c0_6], %5 {strides = array<i32>} : memref<32x128xf32, #tpu.memory_space<vmem>>, vector<32x128xf32>,
    return
  }
  func.func @transform_0(%arg0: i32) -> (i32, i32) {
    %c0_i32 = arith.constant 0 : i32
    %c0_i32_0 = arith.constant 0 : i32
    return %arg0, %c0_i32 : i32, i32
  }
  func.func @transform_1(%arg0: i32) -> (i32, i32) {
    %c0_i32 = arith.constant 0 : i32
    %c0_i32_0 = arith.constant 0 : i32
    %c0_i32_1 = arith.constant 0 : i32
    return %c0_i32, %c0_i32_0 : i32, i32
  }
  func.func @transform_2(%arg0: i32) -> (i32, i32) {
    %c0_i32 = arith.constant 0 : i32
    %c0_i32_0 = arith.constant 0 : i32
    %c0_i32_1 = arith.constant 0 : i32
    return %c0_i32, %c0_i32_0 : i32, i32
  }
  func.func @transform_3(%arg0: i32) -> (i32, i32) {
    %c0_i32 = arith.constant 0 : i32
    %c0_i32_0 = arith.constant 0 : i32
    return %arg0, %c0_i32 : i32, i32
  }
}

</mosaic_0001>

<bundles_post_ra>
// kernel: patch_embed.2
= control target key start
LH: loop header
LB: loop body
LE: loop exit
PB: predicated region body
PF: predicated region fallthrough
CT: control target
= control target key end

     0   :  { %s416_s0 = inlined_call_operand.vmem [shape: bf16[128,128], index: 0, kind: input, shape index: {}]   ;;  %s417_s1 = inlined_call_operand.vmem [shape: f32[1,128], index: 1, kind: input, shape index: {}]   ;;  %s418_s2 = inlined_call_operand.vmem [shape: bf16[32,48], index: 2, kind: input, shape index: {}]   ;;  %s419_s3 = inlined_call_operand.<no memory space> [shape: bf16[], index: 3, kind: input, shape index: {}]   ;;  %s420_s4 = inlined_call_operand.hbm [shape: f32[32,128], index: 4, kind: output, shape index: {}]  }
   0x1   :  { %v9_v0 = vstv %s419_s3 }
   0x2   :  { %v10_v1 = vunpack.i.l.bf16 %v9_v0 }
   0x3   :  { %v316_v2 = vld [vmem:[%s416_s0 + $0x38] sm:$0xff]   ;;  %v33_v3 = vlaneseq  ;;  %v317_v4 = vld [vmem:[%s416_s0 + $0x30] sm:$0xff]   ;;  %v318_v5 = vld [vmem:[%s416_s0 + $0x28] sm:$0xff]  }
   0x4   :  { %292 = vmatprep.subr.bf16.mxu0 %v316_v2  ;;  %v319_v7 = vld [vmem:[%s416_s0 + $0x20] sm:$0xff]   ;;  %v269_v9 = vld [vmem:[%s418_s2 + $0x8] sm:$0xff]  }
   0x5   :  { %293 = vmatpush3.bf16.msra.mxu0 %v316_v2  ;;  %v34_v6 = vand.u32 127, %v33_v3  ;;  %v30_v8 = vld [vmem:[%s418_s2] sm:$0xff]  }
   0x6   :  { %294 = vmatprep.subr.bf16.mxu0 %v317_v4 }
   0x7   :  { %vm36_vm0 = vcmp.lt.s32.totalorder %v34_v6, 48 }
   0x9   :  { %295 = vmatpush3.bf16.msra.mxu0 %v317_v4 }
   0xa   :  { %296 = vmatprep.subr.bf16.mxu0 %v318_v5 }
   0xb   :  { %14 = vsyncpa [#allocation8], 0  ;;  %v31_v10 = vunpack.c.l.bf16 %v30_v8  ;;  %v53_v11 = vunpack.c.h.bf16 %v30_v8  ;;  %v76_v12 = vunpack.c.l.bf16 %v269_v9  ;;  %v99_v13 = vunpack.c.h.bf16 %v269_v9  ;;  %v320_v18 = vld [vmem:[%s416_s0 + $0x18] sm:$0xff]   ;;  %v321_v24 = vld [vmem:[%s416_s0 + $0x10] sm:$0xff]   ;;  %s349_s11 = smov [#allocation7]  }
   0xc   :  { %v348_v19 = vmov 0.0   ;;  %v322_v25 = vld [vmem:[%s416_s0 + $0x8] sm:$0xff]   ;;  %v323_v27 = vld [vmem:[%s416_s0] sm:$0xff]   ;;  %s257_s12 = sshll.u32 %s349_s11, 4  ;;  %s258_s12 = int_to_ptr.vmem [resolvable:$true] %s257_s12 }
   0xd   :  { %297 = vmatpush3.bf16.msra.mxu0 %v318_v5  ;;  %v37_v14 = vsel %vm36_vm0, %v31_v10, %v10_v1  ;;  %v59_v15 = vsel %vm36_vm0, %v53_v11, %v10_v1  ;;  %v82_v16 = vsel %vm36_vm0, %v76_v12, %v10_v1  ;;  %v105_v17 = vsel %vm36_vm0, %v99_v13, %v10_v1  ;;  %v271_v29 = vld [vmem:[%s417_s1] ss:$0 sm:$0xff]  ;;  %s326_s0 = scalar_lea.vmem %s258_s12, 512  ;;  %p331_p1 = scmp.lt.s32.totalorder %s258_s12, %s258_s12 }
   0xe   :  { %298 = vmatprep.subr.bf16.mxu0 %v319_v7  ;;  %v38_v20 = vpack.c.bf16 %v348_v19, %v37_v14  ;;  %v61_v21 = vpack.c.bf16 %v348_v19, %v59_v15  ;;  %v84_v22 = vpack.c.bf16 %v348_v19, %v82_v16  ;;  %v107_v23 = vpack.c.bf16 %v348_v19, %v105_v17  ;;  %p327_p0 = scmp.ne.s32.totalorder %s258_s12, %s326_s0  ;;  %p332_p2 = scmp.lt.s32.totalorder %s326_s0, %s326_s0 }
  0x10   :  { %41 = vst [vmem:[#allocation9] sm:$0xf] %v38_v20  ;;  %64 = vst [vmem:[#allocation9 + $0x4] sm:$0xf] %v61_v21  ;;  %p333_p3 = por %p332_p2, %p331_p1 }
  0x11   :  { %87 = vst [vmem:[#allocation9 + $0x8] sm:$0xf] %v84_v22  ;;  %110 = vst [vmem:[#allocation9 + $0xc] sm:$0xf] %v107_v23  ;;  %299 = vmatpush3.bf16.msra.mxu0 %v319_v7 }
  0x12   :  { %300 = vmatprep.subr.bf16.mxu0 %v320_v18  ;;  %p334_p4 = pnand %p333_p3, %p327_p0 }
  0x15   :  { %301 = vmatpush3.bf16.msra.mxu0 %v320_v18 }
  0x16   :  { %302 = vmatprep.subr.bf16.mxu0 %v321_v24 }
  0x17   :  { %v324_v26 = vld [vmem:[#allocation9] sm:$0xff]  }
  0x18   :  { %308 = vmatprep.mubr.bf16.mxu0 %v324_v26  ;;  %v325_v28 = vld [vmem:[#allocation9 + $0x8] sm:$0xff]  }
  0x19   :  { %303 = vmatpush3.bf16.msra.mxu0 %v321_v24 }
  0x1a   :  { %304 = vmatprep.subr.bf16.mxu0 %v322_v25 }
  0x1d   :  { %305 = vmatpush3.bf16.msra.mxu0 %v322_v25 }
  0x1e   :  { %306 = vmatprep.subr.bf16.mxu0 %v323_v27 }
  0x21   :  { %307 = vmatpush3.bf16.msra.mxu0 %v323_v27 }
  0x24   :  { %309 = vmatmul.mubr.bf16.vlgmr.msra.gmra.mxu0 %v325_v28 }
  0xe4   :  { %v310_v30 = vpop.f32.mrf.mxu0 }
  0xe5   :  { %v242_v31 = vadd.f32 %v310_v30, %v271_v29 }
  0xe6   :  { %v233_v32 = vpop.f32.mrf.mxu0 }
  0xe7   :  { %250 = vst [vmem:[#allocation7 + $0x10] sm:$0xff] %v242_v31  ;;  %v234_v33 = vadd.f32 %v271_v29, %v233_v32 }
  0xe8   :  { %v311_v34 = vpop.f32.mrf.mxu0 }
  0xe9   :  { %248 = vst [vmem:[#allocation7] sm:$0xff] %v234_v33  ;;  %v245_v35 = vadd.f32 %v311_v34, %v271_v29 }
  0xea   :  { %v236_v36 = vpop.f32.mrf.mxu0 }
  0xeb   :  { %251 = vst [vmem:[#allocation7 + $0x18] sm:$0xff] %v245_v35  ;;  %v237_v37 = vadd.f32 %v271_v29, %v236_v36 }
  0xed   :  { %249 = vst [vmem:[#allocation7 + $0x8] sm:$0xff] %v237_v37 }
  0xee   :  { %337 = shalt.err (!%p334_p4)
}
  0xef   :  { %s350_s1 = smov 128   ;;  %s351_s13 = smov 8  }
  0xf0   :  { %263 = dma.vmem_to_hbm [thread:$0]  %s258_s12, 512, %s420_s4, [#allocation8], %s350_s1, %s350_s1, %s351_s13  }
  0xf1   :  { %346 = dma.done.wait [#allocation8], 512  }
  0xf2   :  { %347 = vsyncadd [#allocation8], 4294966784 }
  0xf3   :  { %267 = vsyncpa [#allocation8], 1 }

</bundles_post_ra>
